<compile_context>
chip_gen: v5e
topology: v5e:2x2
jax: 0.10.0
libtpu: 0.0.40
codegen_flags: <defaults>
</compile_context>

<pallas_src>
import functools

import jax
import jax.numpy as jnp
from jax.experimental import pallas as pl
from jax.experimental.pallas import tpu as pltpu

LATENT_DIM = 32
PARAM_DIM = 6
HIDDEN = 128


def _round_up(x, m):
    return ((x + m - 1) // m) * m


def _recommender_kernel(z_ref, w1_ref, b1_ref, w2_ref, b2_ref, w3_ref, b3_ref,
                        eps_ref, sig_ref, mu_ref, lv_ref):
    """One batch tile: 3 matmuls + ReLUs + reparameterize + sigmoid."""
    mm_dtype = w1_ref.dtype  # bf16 (full-rate MXU) or f32

    # z arrives f32; cast in-kernel (VPU work hidden under the input DMA).
    z = z_ref[...].astype(mm_dtype)

    # Linear(latent_dim, 128) + ReLU  (f32 accumulation on the MXU).
    h1 = jnp.dot(z, w1_ref[...], preferred_element_type=jnp.float32) + b1_ref[...]
    h1 = jnp.maximum(h1, 0.0).astype(mm_dtype)

    # Linear(128, 128) + ReLU.
    h2 = jnp.dot(h1, w2_ref[...], preferred_element_type=jnp.float32) + b2_ref[...]
    h2 = jnp.maximum(h2, 0.0).astype(mm_dtype)

    # Linear(128, 2*param_dim): one matmul; mu / log_var are free lane slices.
    p = jnp.dot(h2, w3_ref[...], preferred_element_type=jnp.float32) + b3_ref[...]
    mu = p[:, :PARAM_DIM]
    log_var = p[:, PARAM_DIM:]

    # reparameterize + sigmoid (EUP transcendentals, f32).
    std = jnp.exp(0.5 * log_var)
    sampled = mu + eps_ref[...] * std

    sig_ref[...] = jax.nn.sigmoid(sampled)
    mu_ref[...] = mu
    lv_ref[...] = log_var


@functools.partial(jax.jit, static_argnames=("block_batch", "matmul_dtype"))
def stochastic_noise_recommender(z, w1, b1, w2, b2, w3, b3, eps,
                                 *, block_batch=2048,
                                 matmul_dtype=jnp.bfloat16):
    """Returns (sigmoid(sampled), mu, log_var), each [B, PARAM_DIM] f32."""
    B = z.shape[0]
    P = PARAM_DIM

    # Batch tile: a multiple of 8 sublanes that never exceeds B, so no
    # wrapper-side jnp.pad is needed (Pallas masks the ragged last block).
    if B <= 8:
        tb = B                                  # single full-extent block
    else:
        tb = min(block_batch, (B // 8) * 8)
        # v7x: keep >= 2 grid steps so the "parallel" batch axis can be
        # sharded across both TensorCores.
        if pl.cdiv(B, tb) < 2 and B >= 16:
            tb = _round_up(pl.cdiv(B, 2), 8)
    grid = (pl.cdiv(B, tb),)

    # Weight casts stay in the wrapper (tiny, one-time); z is cast in-kernel.
    w1_mm = w1.astype(matmul_dtype)
    w2_mm = w2.astype(matmul_dtype)
    w3_mm = w3.astype(matmul_dtype)

    def batch_spec(cols):
        return pl.BlockSpec((tb, cols), lambda i: (i, 0))

    def resident_spec(shape):
        # Constant block index -> fetched once, VMEM-resident across the grid.
        return pl.BlockSpec(shape, lambda i: (0, 0))

    rows = grid[0] * tb
    w_elems = LATENT_DIM * HIDDEN + HIDDEN * HIDDEN + HIDDEN * 2 * P
    itemsize = jnp.dtype(matmul_dtype).itemsize
    cost = pl.CostEstimate(
        flops=2 * rows * w_elems,
        transcendentals=2 * rows * P,
        bytes_accessed=int(rows * (LATENT_DIM * 4      # z (f32 in)
                                   + P * 4             # eps
                                   + 3 * P * 4)        # three outputs
                           + w_elems * itemsize
                           + (2 * HIDDEN + 2 * P) * 4))

    # Explicit VMEM budget: ~10 KB/row covers double-buffered z/eps/out tiles
    # (lane-padded to 128) plus f32/bf16 intermediates; keeps v5e's 16 MiB
    # scoped default from shrinking the pipeline and stays within v7x's 64 MiB.
    vmem_limit = int(min(64 << 20, max(32 << 20, 10 * 1024 * tb)))

    sig, mu, lv = pl.pallas_call(
        _recommender_kernel,
        out_shape=(jax.ShapeDtypeStruct((B, P), jnp.float32),
                   jax.ShapeDtypeStruct((B, P), jnp.float32),
                   jax.ShapeDtypeStruct((B, P), jnp.float32)),
        grid=grid,
        in_specs=[
            batch_spec(LATENT_DIM),                # z        (per-tile, f32)
            resident_spec((LATENT_DIM, HIDDEN)),   # W1
            resident_spec((1, HIDDEN)),            # b1
            resident_spec((HIDDEN, HIDDEN)),       # W2
            resident_spec((1, HIDDEN)),            # b2
            resident_spec((HIDDEN, 2 * P)),        # W3
            resident_spec((1, 2 * P)),             # b3
            batch_spec(P),                         # eps      (per-tile)
        ],
        out_specs=(batch_spec(P), batch_spec(P), batch_spec(P)),
        compiler_params=pltpu.CompilerParams(
            dimension_semantics=("parallel",),
            vmem_limit_bytes=vmem_limit),
        cost_estimate=cost,
    )(z, w1_mm, b1, w2_mm, b2, w3_mm, b3, eps)

    return sig, mu, lv


def init_params(key):
    """Deterministic init mimicking PyTorch Linear default (uniform +/- 1/sqrt(fan_in))."""
    ks = jax.random.split(key, 6)

    def linear(kw, kb, fan_in, fan_out):
        bound = 1.0 / jnp.sqrt(fan_in)
        w = jax.random.uniform(kw, (fan_in, fan_out), jnp.float32, -bound, bound)
        b = jax.random.uniform(kb, (1, fan_out), jnp.float32, -bound, bound)
        return w, b

    w1, b1 = linear(ks[0], ks[1], LATENT_DIM, HIDDEN)
    w2, b2 = linear(ks[2], ks[3], HIDDEN, HIDDEN)
    w3, b3 = linear(ks[4], ks[5], HIDDEN, 2 * PARAM_DIM)
    return w1, b1, w2, b2, w3, b3


def _reference(z, w1, b1, w2, b2, w3, b3, eps, matmul_dtype):
    """Pure-JAX reference with dtypes matched to the kernel path."""
    f32 = jnp.float32
    h1 = jnp.maximum(
        jnp.dot(z.astype(matmul_dtype), w1.astype(matmul_dtype),
                preferred_element_type=f32) + b1, 0.0).astype(matmul_dtype)
    h2 = jnp.maximum(
        jnp.dot(h1, w2.astype(matmul_dtype),
                preferred_element_type=f32) + b2, 0.0).astype(matmul_dtype)
    p = jnp.dot(h2, w3.astype(matmul_dtype), preferred_element_type=f32) + b3
    mu, lv = p[:, :PARAM_DIM], p[:, PARAM_DIM:]
    sig = jax.nn.sigmoid(mu + eps * jnp.exp(0.5 * lv))
    return sig, mu, lv


if __name__ == "__main__":
    key = jax.random.PRNGKey(0)
    k_param, k_z, k_eps = jax.random.split(key, 3)
    w1, b1, w2, b2, w3, b3 = init_params(k_param)

    # Case 1: small batch, bf16 matmul path (recommended config), single block.
    B = 8
    z = jax.random.normal(k_z, (B, LATENT_DIM), jnp.float32)
    eps = jax.random.normal(k_eps, (B, PARAM_DIM), jnp.float32)
    sig, mu, lv = stochastic_noise_recommender(z, w1, b1, w2, b2, w3, b3, eps)
    jax.block_until_ready((sig, mu, lv))
    sig_r, mu_r, lv_r = _reference(z, w1, b1, w2, b2, w3, b3, eps, jnp.bfloat16)
    assert sig.shape == (B, PARAM_DIM) and mu.shape == (B, PARAM_DIM) and lv.shape == (B, PARAM_DIM)
    assert jnp.allclose(sig, sig_r, atol=5e-3, rtol=5e-3)
    assert jnp.allclose(mu, mu_r, atol=5e-3, rtol=5e-3)
    assert jnp.allclose(lv, lv_r, atol=5e-3, rtol=5e-3)

    # Case 2: non-multiple-of-8 batch (exercises the ragged last block and a
    # 2-step grid) with f32 matmuls.
    B2 = 10
    z2 = jax.random.normal(jax.random.fold_in(k_z, 1), (B2, LATENT_DIM), jnp.float32)
    eps2 = jax.random.normal(jax.random.fold_in(k_eps, 1), (B2, PARAM_DIM), jnp.float32)
    sig2, mu2, lv2 = stochastic_noise_recommender(
        z2, w1, b1, w2, b2, w3, b3, eps2, matmul_dtype=jnp.float32)
    jax.block_until_ready((sig2, mu2, lv2))
    sig2_r, mu2_r, lv2_r = _reference(z2, w1, b1, w2, b2, w3, b3, eps2, jnp.float32)
    assert sig2.shape == (B2, PARAM_DIM)
    # Loose tolerance: XLA / Mosaic may use different f32-matmul pass counts.
    assert jnp.allclose(sig2, sig2_r, atol=3e-2, rtol=3e-2)
    assert jnp.allclose(mu2, mu2_r, atol=3e-2, rtol=3e-2)
    assert jnp.allclose(lv2, lv2_r, atol=3e-2, rtol=3e-2)
    assert not bool(jnp.any(jnp.isnan(sig2))) and not bool(jnp.any(jnp.isnan(mu2)))

    print("KERNEL_OK")
</pallas_src>

<mosaic_0001>
module attributes {stable_mosaic.version = 11 : i64} {
  func.func @_recommender_kernel(%arg0: i32, %arg1: memref<8x32xf32, #tpu.memory_space<vmem>>, %arg2: memref<32x128xbf16, #tpu.memory_space<vmem>>, %arg3: memref<1x128xf32, #tpu.memory_space<vmem>>, %arg4: memref<128x128xbf16, #tpu.memory_space<vmem>>, %arg5: memref<1x128xf32, #tpu.memory_space<vmem>>, %arg6: memref<128x12xbf16, #tpu.memory_space<vmem>>, %arg7: memref<1x12xf32, #tpu.memory_space<vmem>>, %arg8: memref<8x6xf32, #tpu.memory_space<vmem>>, %arg9: memref<8x6xf32, #tpu.memory_space<vmem>>, %arg10: memref<8x6xf32, #tpu.memory_space<vmem>>, %arg11: memref<8x6xf32, #tpu.memory_space<vmem>>) attributes {dimension_semantics = [#tpu.dimension_semantics<parallel>], iteration_bounds = array<i64: 1>, scalar_prefetch = 0 : i64, scratch_operands = 0 : i64, tpu.core_type = #tpu.core_type<tc>, window_params = [{transform_indices = @transform_0, window_bounds = array<i64: 8, 32>}, {pipeline_mode = #tpu.pipeline_mode<synchronous>, transform_indices = @transform_1, window_bounds = array<i64: 32, 128>}, {pipeline_mode = #tpu.pipeline_mode<synchronous>, transform_indices = @transform_2, window_bounds = array<i64: 1, 128>}, {pipeline_mode = #tpu.pipeline_mode<synchronous>, transform_indices = @transform_3, window_bounds = array<i64: 128, 128>}, {pipeline_mode = #tpu.pipeline_mode<synchronous>, transform_indices = @transform_4, window_bounds = array<i64: 1, 128>}, {pipeline_mode = #tpu.pipeline_mode<synchronous>, transform_indices = @transform_5, window_bounds = array<i64: 128, 12>}, {pipeline_mode = #tpu.pipeline_mode<synchronous>, transform_indices = @transform_6, window_bounds = array<i64: 1, 12>}, {transform_indices = @transform_7, window_bounds = array<i64: 8, 6>}, {transform_indices = @transform_8, window_bounds = array<i64: 8, 6>}, {transform_indices = @transform_9, window_bounds = array<i64: 8, 6>}, {transform_indices = @transform_10, window_bounds = array<i64: 8, 6>}]} {
    %c0 = arith.constant 0 : index
    %c0_0 = arith.constant 0 : index
    %0 = vector.load %arg1[%c0, %c0_0] : memref<8x32xf32, #tpu.memory_space<vmem>>, vector<8x32xf32>
    %1 = arith.truncf %0 : vector<8x32xf32> to vector<8x32xbf16>
    %c0_1 = arith.constant 0 : index
    %c0_2 = arith.constant 0 : index
    %2 = vector.load %arg2[%c0_1, %c0_2] : memref<32x128xbf16, #tpu.memory_space<vmem>>, vector<32x128xbf16>
    %cst = arith.constant dense<0.000000e+00> : vector<8x128xf32>
    %3 = tpu.matmul %1, %2, %cst {dimension_numbers = #tpu.dot_dimension_numbers<[1], [0], [0], [1], [0, 0, 1, 1], [], []>} : vector<8x32xbf16>, vector<32x128xbf16>, vector<8x128xf32> -> vector<8x128xf32>
    %c0_3 = arith.constant 0 : index
    %c0_4 = arith.constant 0 : index
    %4 = vector.load %arg3[%c0_3, %c0_4] : memref<1x128xf32, #tpu.memory_space<vmem>>, vector<1x128xf32>
    %5 = vector.broadcast %4 : vector<1x128xf32> to vector<8x128xf32>
    %6 = arith.addf %3, %5 : vector<8x128xf32>
    %cst_5 = arith.constant 0.000000e+00 : f32
    %7 = vector.broadcast %cst_5 : f32 to vector<8x128xf32>
    %8 = arith.maximumf %6, %7 : vector<8x128xf32>
    %9 = arith.truncf %8 : vector<8x128xf32> to vector<8x128xbf16>
    %c0_6 = arith.constant 0 : index
    %c0_7 = arith.constant 0 : index
    %10 = vector.load %arg4[%c0_6, %c0_7] : memref<128x128xbf16, #tpu.memory_space<vmem>>, vector<128x128xbf16>
    %cst_8 = arith.constant dense<0.000000e+00> : vector<8x128xf32>
    %11 = tpu.matmul %9, %10, %cst_8 {dimension_numbers = #tpu.dot_dimension_numbers<[1], [0], [0], [1], [0, 0, 1, 1], [], []>} : vector<8x128xbf16>, vector<128x128xbf16>, vector<8x128xf32> -> vector<8x128xf32>
    %c0_9 = arith.constant 0 : index
    %c0_10 = arith.constant 0 : index
    %12 = vector.load %arg5[%c0_9, %c0_10] : memref<1x128xf32, #tpu.memory_space<vmem>>, vector<1x128xf32>
    %13 = vector.broadcast %12 : vector<1x128xf32> to vector<8x128xf32>
    %14 = arith.addf %11, %13 : vector<8x128xf32>
    %cst_11 = arith.constant 0.000000e+00 : f32
    %15 = vector.broadcast %cst_11 : f32 to vector<8x128xf32>
    %16 = arith.maximumf %14, %15 : vector<8x128xf32>
    %17 = arith.truncf %16 : vector<8x128xf32> to vector<8x128xbf16>
    %c0_12 = arith.constant 0 : index
    %c0_13 = arith.constant 0 : index
    %18 = vector.load %arg6[%c0_12, %c0_13] : memref<128x12xbf16, #tpu.memory_space<vmem>>, vector<128x12xbf16>
    %cst_14 = arith.constant dense<0.000000e+00> : vector<8x12xf32>
    %19 = tpu.matmul %17, %18, %cst_14 {dimension_numbers = #tpu.dot_dimension_numbers<[1], [0], [0], [1], [0, 0, 1, 1], [], []>} : vector<8x128xbf16>, vector<128x12xbf16>, vector<8x12xf32> -> vector<8x12xf32>
    %c0_15 = arith.constant 0 : index
    %c0_16 = arith.constant 0 : index
    %20 = vector.load %arg7[%c0_15, %c0_16] : memref<1x12xf32, #tpu.memory_space<vmem>>, vector<1x12xf32>
    %21 = vector.broadcast %20 : vector<1x12xf32> to vector<8x12xf32>
    %22 = arith.addf %19, %21 : vector<8x12xf32>
    %23 = vector.extract_strided_slice %22 {offsets = [0, 0], sizes = [8, 6], strides = [1, 1]} : vector<8x12xf32> to vector<8x6xf32>
    %24 = vector.extract_strided_slice %22 {offsets = [0, 6], sizes = [8, 6], strides = [1, 1]} : vector<8x12xf32> to vector<8x6xf32>
    %cst_17 = arith.constant 5.000000e-01 : f32
    %25 = vector.broadcast %cst_17 : f32 to vector<8x6xf32>
    %26 = arith.mulf %25, %24 : vector<8x6xf32>
    %27 = math.exp %26 : vector<8x6xf32>
    %c0_18 = arith.constant 0 : index
    %c0_19 = arith.constant 0 : index
    %28 = vector.load %arg8[%c0_18, %c0_19] : memref<8x6xf32, #tpu.memory_space<vmem>>, vector<8x6xf32>
    %29 = arith.mulf %28, %27 : vector<8x6xf32>
    %30 = arith.addf %23, %29 : vector<8x6xf32>
    %31 = arith.negf %30 : vector<8x6xf32>
    %32 = math.exp %31 : vector<8x6xf32>
    %cst_20 = arith.constant 1.000000e+00 : f32
    %33 = vector.broadcast %cst_20 : f32 to vector<8x6xf32>
    %34 = arith.addf %33, %32 : vector<8x6xf32>
    %35 = arith.divf %33, %34 : vector<8x6xf32>
    %c0_21 = arith.constant 0 : index
    %c0_22 = arith.constant 0 : index
    %36 = vector.load %arg9[%c0_21, %c0_22] : memref<8x6xf32, #tpu.memory_space<vmem>>, vector<8x6xf32>
    tpu.vector_store %arg9[%c0_21, %c0_22], %35 {strides = array<i32>} : memref<8x6xf32, #tpu.memory_space<vmem>>, vector<8x6xf32>,
    %c0_23 = arith.constant 0 : index
    %c0_24 = arith.constant 0 : index
    %37 = vector.load %arg10[%c0_23, %c0_24] : memref<8x6xf32, #tpu.memory_space<vmem>>, vector<8x6xf32>
    tpu.vector_store %arg10[%c0_23, %c0_24], %23 {strides = array<i32>} : memref<8x6xf32, #tpu.memory_space<vmem>>, vector<8x6xf32>,
    %c0_25 = arith.constant 0 : index
    %c0_26 = arith.constant 0 : index
    %38 = vector.load %arg11[%c0_25, %c0_26] : memref<8x6xf32, #tpu.memory_space<vmem>>, vector<8x6xf32>
    tpu.vector_store %arg11[%c0_25, %c0_26], %24 {strides = array<i32>} : memref<8x6xf32, #tpu.memory_space<vmem>>, vector<8x6xf32>,
    return
  }
  func.func @transform_0(%arg0: i32) -> (i32, i32) {
    %c0_i32 = arith.constant 0 : i32
    %c0_i32_0 = arith.constant 0 : i32
    return %arg0, %c0_i32 : i32, i32
  }
  func.func @transform_1(%arg0: i32) -> (i32, i32) {
    %c0_i32 = arith.constant 0 : i32
    %c0_i32_0 = arith.constant 0 : i32
    %c0_i32_1 = arith.constant 0 : i32
    return %c0_i32, %c0_i32_0 : i32, i32
  }
  func.func @transform_2(%arg0: i32) -> (i32, i32) {
    %c0_i32 = arith.constant 0 : i32
    %c0_i32_0 = arith.constant 0 : i32
    %c0_i32_1 = arith.constant 0 : i32
    return %c0_i32, %c0_i32_0 : i32, i32
  }
  func.func @transform_3(%arg0: i32) -> (i32, i32) {
    %c0_i32 = arith.constant 0 : i32
    %c0_i32_0 = arith.constant 0 : i32
    %c0_i32_1 = arith.constant 0 : i32
    return %c0_i32, %c0_i32_0 : i32, i32
  }
  func.func @transform_4(%arg0: i32) -> (i32, i32) {
    %c0_i32 = arith.constant 0 : i32
    %c0_i32_0 = arith.constant 0 : i32
    %c0_i32_1 = arith.constant 0 : i32
    return %c0_i32, %c0_i32_0 : i32, i32
  }
  func.func @transform_5(%arg0: i32) -> (i32, i32) {
    %c0_i32 = arith.constant 0 : i32
    %c0_i32_0 = arith.constant 0 : i32
    %c0_i32_1 = arith.constant 0 : i32
    return %c0_i32, %c0_i32_0 : i32, i32
  }
  func.func @transform_6(%arg0: i32) -> (i32, i32) {
    %c0_i32 = arith.constant 0 : i32
    %c0_i32_0 = arith.constant 0 : i32
    %c0_i32_1 = arith.constant 0 : i32
    return %c0_i32, %c0_i32_0 : i32, i32
  }
  func.func @transform_7(%arg0: i32) -> (i32, i32) {
    %c0_i32 = arith.constant 0 : i32
    %c0_i32_0 = arith.constant 0 : i32
    return %arg0, %c0_i32 : i32, i32
  }
  func.func @transform_8(%arg0: i32) -> (i32, i32) {
    %c0_i32 = arith.constant 0 : i32
    %c0_i32_0 = arith.constant 0 : i32
    return %arg0, %c0_i32 : i32, i32
  }
  func.func @transform_9(%arg0: i32) -> (i32, i32) {
    %c0_i32 = arith.constant 0 : i32
    %c0_i32_0 = arith.constant 0 : i32
    return %arg0, %c0_i32 : i32, i32
  }
  func.func @transform_10(%arg0: i32) -> (i32, i32) {
    %c0_i32 = arith.constant 0 : i32
    %c0_i32_0 = arith.constant 0 : i32
    return %arg0, %c0_i32 : i32, i32
  }
}

</mosaic_0001>

<bundles_post_ra>
// kernel: stochastic_noise_recommender.1
= control target key start
LH: loop header
LB: loop body
LE: loop exit
PB: predicated region body
PF: predicated region fallthrough
CT: control target
= control target key end

     0   :  { %16 = vsyncpa [#allocation3], 0  ;;  %s645_s0 = inlined_call_operand.vmem [shape: f32[8,32], index: 0, kind: input, shape index: {}]   ;;  %s646_s1 = inlined_call_operand.vmem [shape: bf16[32,128], index: 1, kind: input, shape index: {}]   ;;  %s647_s2 = inlined_call_operand.vmem [shape: f32[1,128], index: 2, kind: input, shape index: {}]   ;;  %s648_s3 = inlined_call_operand.vmem [shape: bf16[128,128], index: 3, kind: input, shape index: {}]   ;;  %s649_s4 = inlined_call_operand.vmem [shape: f32[1,128], index: 4, kind: input, shape index: {}]   ;;  %s650_s5 = inlined_call_operand.vmem [shape: bf16[128,12], index: 5, kind: input, shape index: {}]   ;;  %s651_s6 = inlined_call_operand.vmem [shape: f32[1,12], index: 6, kind: input, shape index: {}]   ;;  %s652_s7 = inlined_call_operand.vmem [shape: f32[8,6], index: 7, kind: input, shape index: {}]   ;;  %s653_s8 = inlined_call_operand.hbm [shape: f32[8,6], index: 8, kind: output, shape index: {0}]   ;;  %s654_s9 = inlined_call_operand.hbm [shape: f32[8,6], index: 9, kind: output, shape index: {1}]   ;;  %s655_s10 = inlined_call_operand.hbm [shape: f32[8,6], index: 10, kind: output, shape index: {2}]  }
   0x1   :  { %v399_v0 = vld [vmem:[%s646_s1 + $0x8] sm:$0xff]  ;;  %v407_v1 = vld [vmem:[%s648_s3 + $0x38] sm:$0xff]  ;;  %v398_v2 = vld [vmem:[%s646_s1] sm:$0xff] }
   0x2   :  { %67 = vmatpush.bf16.msra.mxu0 %v399_v0  ;;  %v35_v3 = vld [vmem:[%s645_s0] sm:$0xff]  ;;  %144 = vmatpush.bf16.msra.mxu1 %v407_v1  ;;  %v406_v4 = vld [vmem:[%s648_s3 + $0x30] sm:$0xff] }
   0x3   :  { %17 = vsyncpa [#allocation5], 0  ;;  %v36_v5 = vpack.c.bf16 %v35_v3, %v35_v3  ;;  %vm57_vm0 = vcmask 261120   ;;  %v405_v6 = vld [vmem:[%s648_s3 + $0x28] sm:$0xff]  ;;  %v404_v7 = vld [vmem:[%s648_s3 + $0x20] sm:$0xff]  ;;  %vm269_vm1 = vcmask 48128  }
   0x4   :  { %v403_v8 = vld [vmem:[%s648_s3 + $0x18] sm:$0xff]  ;;  %v402_v9 = vld [vmem:[%s648_s3 + $0x10] sm:$0xff]  ;;  %v401_v10 = vld [vmem:[%s648_s3 + $0x8] sm:$0xff]  ;;  %s295_s12 = sshll.u32 %s654_s9, 4  ;;  %s506_s13 = smov [#allocation4]   ;;  %s296_s12 = int_to_ptr.hbm [resolvable:$true] %s295_s12 }
   0x5   :  { %v400_v11 = vld [vmem:[%s648_s3] sm:$0xff]  ;;  %v415_v12 = vld [vmem:[%s650_s5 + $0x38] sm:$0xff]  ;;  %v414_v13 = vld [vmem:[%s650_s5 + $0x30] sm:$0xff]  ;;  %s293_s14 = sshll.u32 %s506_s13, 4  ;;  %s507_s16 = smov [#allocation6]   ;;  %s294_s14 = int_to_ptr.vmem [resolvable:$true] %s293_s14 }
   0x6   :  { %68 = vmatpush.bf16.msra.mxu0 %v398_v2  ;;  %145 = vmatpush.bf16.msra.mxu1 %v406_v4  ;;  %v413_v14 = vld [vmem:[%s650_s5 + $0x28] sm:$0xff]  ;;  %v412_v15 = vld [vmem:[%s650_s5 + $0x20] sm:$0xff]  ;;  %v411_v16 = vld [vmem:[%s650_s5 + $0x18] sm:$0xff]  ;;  %s304_s17 = sshll.u32 %s507_s16, 4  ;;  %s306_s20 = sshll.u32 %s655_s10, 4  ;;  %s305_s17 = int_to_ptr.vmem [resolvable:$true] %s304_s17  ;;  %s307_s20 = int_to_ptr.hbm [resolvable:$true] %s306_s20 }
   0x7   :  { %227 = vmatpush.bf16.msra.mxu2 %v415_v12  ;;  %v410_v17 = vld [vmem:[%s650_s5 + $0x10] sm:$0xff]  ;;  %v420_v18 = vld [vmem:[%s647_s2] ss:$0 sm:$0xff]  ;;  %v409_v24 = vld [vmem:[%s650_s5 + $0x8] sm:$0xff]  ;;  %s284_s21 = sshll.u32 %s653_s8, 4  ;;  %s285_s21 = int_to_ptr.hbm [resolvable:$true] %s284_s21 }
   0x8   :  { %v408_v25 = vld [vmem:[%s650_s5] sm:$0xff] }
   0x9   :  { %332 = vmatmul.msk.bf16.vlgmr.msra.gmra.mxu0 %vm57_vm0, %v36_v5  ;;  %v421_v26 = vld [vmem:[%s649_s4] ss:$0 sm:$0xff]  ;;  %s505_s4 = smov 122  }
   0xa   :  { %146 = vmatpush.bf16.msra.mxu1 %v405_v6  ;;  %v422_v32 = vld [vmem:[%s651_s6] ss:$0 sm:$0xff] }
   0xb   :  { %228 = vmatpush.bf16.msra.mxu2 %v414_v13  ;;  %v243_v39 = vld [vmem:[%s652_s7] sm:$0xff]  ;;  %s508_s7 = smov [#allocation2]  }
   0xc   :  { %s282_s9 = sshll.u32 %s508_s7, 4  ;;  %s283_s9 = int_to_ptr.vmem [resolvable:$true] %s282_s9 }
   0xe   :  { %147 = vmatpush.bf16.msra.mxu1 %v404_v7 }
   0xf   :  { %229 = vmatpush.bf16.msra.mxu2 %v413_v14 }
  0x12   :  { %148 = vmatpush.bf16.msra.mxu1 %v403_v8 }
  0x13   :  { %230 = vmatpush.bf16.msra.mxu2 %v412_v15 }
  0x16   :  { %149 = vmatpush.bf16.msra.mxu1 %v402_v9 }
  0x17   :  { %231 = vmatpush.bf16.msra.mxu2 %v411_v16 }
  0x1a   :  { %150 = vmatpush.bf16.msra.mxu1 %v401_v10 }
  0x1b   :  { %232 = vmatpush.bf16.msra.mxu2 %v410_v17 }
  0x1e   :  { %151 = vmatpush.bf16.msra.mxu1 %v400_v11 }
  0x1f   :  { %233 = vmatpush.bf16.msra.mxu2 %v409_v24 }
  0x23   :  { %234 = vmatpush.bf16.msra.mxu2 %v408_v25 }
  0x86   :  { %v70_v19 = vpop.f32.mrf.mxu0 }
  0x87   :  { %v71_v20 = vadd.f32 %v420_v18, %v70_v19 }
  0x89   :  { %v74_v21 = vmax.f32 %v71_v20, 0.0 }
  0x8b   :  { %v75_v22 = vpack.c.bf16 %v74_v21, %v74_v21 }
  0x8d   :  { %152 = vmatmul.bf16.vlgmr.msra.gmra.mxu1 %v75_v22 }
  0x8e   :  { %v72_v23 = vpop.f32.mrf.mxu0 }
 0x10a   :  { %v153_v27 = vpop.f32.mrf.mxu1 }
 0x10b   :  { %v154_v28 = vadd.f32 %v421_v26, %v153_v27 }
 0x10d   :  { %v157_v29 = vmax.f32 %v154_v28, 0.0 }
 0x10f   :  { %v158_v30 = vpack.c.bf16 %v157_v29, %v157_v29 }
 0x111   :  { %235 = vmatmul.bf16.vlgmr.msra.gmra.mxu2 %v158_v30 }
 0x112   :  { %v155_v31 = vpop.f32.mrf.mxu1 }
 0x194   :  { %v236_v33 = vpop.f32.mrf.mxu2 }
 0x195   :  { %v237_v34 = vadd.f32 %v422_v32, %v236_v33 }
 0x197   :  { %v240_v35 = vmul.f32 0.5, %v237_v34  ;;  %271 = vst.msk [vmem:[#allocation4] sm:$0xff] %vm269_vm1, %v237_v34 }
 0x198   :  { %298 = dma.vmem_to_hbm [thread:$0]  %s294_s14, 128, %s296_s12, [#allocation5]  }
 0x199   :  { %v241_v36 = vmul.f32 1.442695, %v240_v35 }
 0x19b   :  { %423 = vpow2.f32 %v241_v36 }
 0x19c   :  { %v238_v37 = vpop.f32.mrf.mxu2 }
 0x1a1   :  { %v424_v38 = vpop.eup %423 }
 0x1a2   :  { %245 = vrot.lane.b32.xlu0 %v424_v38, %s505_s4 }
 0x1aa   :  { %273 = vrot.lane.b32.xlu0 %v237_v34, %s505_s4 }
 0x214   :  { %v246_v40 = vpop.permute.xlu0 %245 }
 0x215   :  { %v248_v41 = vmul.f32 %v246_v40, %v243_v39 }
 0x217   :  { %v249_v42 = vadd.f32 %v248_v41, %v237_v34 }
 0x219   :  { %v397_v43 = vmul.f32 -1.442695, %v249_v42 }
 0x21b   :  { %425 = vpow2.f32 %v397_v43 }
 0x21c   :  { %v274_v44 = vpop.permute.xlu0 %273 }
 0x21d   :  { %276 = vst.msk [vmem:[#allocation6] sm:$0xff] %vm269_vm1, %v274_v44 }
 0x21e   :  { %309 = dma.vmem_to_hbm [thread:$0]  %s305_s17, 128, %s307_s20, [#allocation5]  }
 0x221   :  { %v426_v45 = vpop.eup %425 }
 0x222   :  { %v253_v46 = vadd.f32 1.0, %v426_v45 }
 0x224   :  { %427 = vrcp.f32 %v253_v46  ;;  %v265_v50 = vand.u32 2147483648, %v253_v46  ;;  %v263_v52 = vand.u32 2147483647, %v253_v46  ;;  %vm259_vm3 = vweird.f32 %v253_v46 }
 0x226   :  { %v266_v54 = vor.u32 1.1754944e-38, %v265_v50  ;;  %vm264_vm5 = vcmp.eq.f32.partialorder %v263_v52, 8.507059e+37 }
 0x22a   :  { %v428_v47 = vpop.eup %427 }
 0x22b   :  { %v255_v48 = vmul.f32 %v428_v47, %v253_v46  ;;  %vm260_vm2 = vweird.f32 %v428_v47 }
 0x22c   :  { %vm261_vm4 = vmor %vm259_vm3, %vm260_vm2 }
 0x22d   :  { %v256_v49 = vsub.f32 1.0, %v255_v48 }
 0x22f   :  { %v257_v51 = vmul.f32 %v428_v47, %v256_v49 }
 0x231   :  { %v258_v53 = vadd.f32 %v428_v47, %v257_v51 }
 0x233   :  { %v262_v55 = vsel %vm261_vm4, %v428_v47, %v258_v53 }
 0x234   :  { %v267_v56 = vsel %vm264_vm5, %v266_v54, %v262_v55 }
 0x235   :  { %270 = vst.msk [vmem:[#allocation2] sm:$0xff] %vm269_vm1, %v267_v56 }
 0x236   :  { %287 = dma.vmem_to_hbm [thread:$0]  %s283_s9, 128, %s285_s21, [#allocation3]  }
 0x237   :  { %501 = dma.done.wait [#allocation3], 128  }
 0x238   :  { %502 = vsyncadd [#allocation3], 4294967168 }
 0x239   :  { %503 = dma.done.wait [#allocation5], 256  }
 0x23a   :  { %504 = vsyncadd [#allocation5], 4294967040 }
 0x23b   :  { %322 = vsyncpa [#allocation3], 1 }
 0x23c   :  { %323 = vsyncpa [#allocation5], 1 }

</bundles_post_ra>
